<compile_context>
chip_gen: v5e
topology: v5e:2x2
jax: 0.10.0
libtpu: 0.0.40
codegen_flags: <defaults>
</compile_context>

<pallas_src>
import functools

import jax
import jax.numpy as jnp
from jax.experimental import pallas as pl
from jax.experimental.pallas import tpu as pltpu


_LANE = 128


# ----------------------------------------------------------------------------
# Small helpers
# ----------------------------------------------------------------------------
def _round_up(x, m):
    return (x + m - 1) // m * m


def _geom(n, tile=None):
    """(padded node count, square tile) used for rows / reduction / columns."""
    if tile is not None:
        # Tiling the lane (last) axis requires a multiple of 128.
        assert tile % _LANE == 0, "explicit tile must be a multiple of 128"
        return _round_up(n, tile), tile
    if n <= 512:                      # single tile: block == full (padded) extent
        np_ = _round_up(n, 16)        # 16: sublane multiple for bf16 blocks
        return np_, np_
    t = 512 if n >= 4096 else 256
    return _round_up(n, t), t


def _vmem_limit_bytes():
    # v7x has only 64 MiB of physical VMEM per TensorCore (v5e/v6e: 128 MiB);
    # keep the scoped request comfortably below that.  All per-step blocks are
    # <= ~2 MiB after K-tiling, so 48 MiB is plenty of headroom everywhere.
    cap = 64 << 20
    try:
        cap = int(getattr(pltpu.get_tpu_info(), "vmem_capacity_bytes", cap))
    except Exception:
        pass
    return int(min(48 << 20, max(16 << 20, cap - (16 << 20))))


def _params(*sems):
    return pltpu.CompilerParams(dimension_semantics=sems,
                                vmem_limit_bytes=_vmem_limit_bytes())


# ----------------------------------------------------------------------------
# Kernels
# ----------------------------------------------------------------------------
def _linear_kernel(x_ref, w_ref, o_ref):
    o_ref[...] = jnp.dot(x_ref[...], w_ref[...],
                         preferred_element_type=jnp.float32).astype(o_ref.dtype)


def _sage_linear_kernel(xn_ref, xs_ref, wn_ref, ws_ref, b_ref, o_ref, *, apply_relu):
    # out = [relu]( XN @ Wn + XS @ Ws + b )   (SAGE layer, bias/relu fused)
    out = jnp.dot(xn_ref[...], wn_ref[...], preferred_element_type=jnp.float32)
    out = out + jnp.dot(xs_ref[...], ws_ref[...], preferred_element_type=jnp.float32)
    out = out + b_ref[...]
    if apply_relu:
        out = jnp.maximum(out, 0.0)
    o_ref[...] = out.astype(o_ref.dtype)


def _agg_kernel(a_ref, p_ref, o_ref, acc_ref, *, apply_relu):
    # K-tiled neighbor aggregation:  out_i = [relu]( sum_k A[i,k] @ P[k] )
    k = pl.program_id(1)

    @pl.when(k == 0)
    def _():
        acc_ref[...] = jnp.zeros_like(acc_ref)

    acc_ref[...] += jnp.dot(a_ref[...], p_ref[...],
                            preferred_element_type=jnp.float32)

    @pl.when(k == pl.num_programs(1) - 1)
    def _():
        out = acc_ref[...]
        if apply_relu:
            out = jnp.maximum(out, 0.0)
        o_ref[...] = out.astype(o_ref.dtype)


def _dist_exp_kernel(er_ref, et_ref, sqr_ref, sqc_ref, p_ref, rs_ref, *, tile, n_real):
    # Pass 1: unnormalized softmax numerators p = exp(-dist) for one (rows, cols)
    # tile, plus f32 row-sum accumulation across the column (reduction) axis.
    j = pl.program_id(1)
    cross = jnp.dot(er_ref[...], et_ref[...],
                    preferred_element_type=jnp.float32)                  # (T, T)
    dist = jnp.maximum(sqr_ref[...] + sqc_ref[...] - 2.0 * cross, 0.0)   # .relu()
    # dist >= 0 and the diagonal distance is ~0, so logits = -dist <= 0 with
    # max ~ 0: exp never overflows and the row sum is >= ~1 -> no row-max pass.
    p = jnp.exp(-dist)
    col = j * tile + jax.lax.broadcasted_iota(jnp.int32, p.shape, 1)
    p = jnp.where(col < n_real, p, 0.0)          # mask zero-padded columns
    pb = p.astype(p_ref.dtype)
    p_ref[...] = pb

    @pl.when(j == 0)
    def _():
        rs_ref[...] = jnp.zeros_like(rs_ref)

    rs_ref[...] += jnp.sum(pb.astype(jnp.float32), axis=1, keepdims=True)


def _dist_norm_kernel(p_ref, rs_ref, o_ref):
    # Pass 2: normalize and add the 1e-10 offset (softmax(-dist) + 1e-10).
    inv = pl.reciprocal(rs_ref[...], approx=True)
    o_ref[...] = (p_ref[...].astype(jnp.float32) * inv + 1e-10).astype(o_ref.dtype)


# ----------------------------------------------------------------------------
# Tiled pallas_call wrappers
# ----------------------------------------------------------------------------
def _tiled_linear(x, w, *, tile, out_dtype):
    n, f_in = x.shape
    f_out = w.shape[1]
    bytes_acc = int(x.size * x.dtype.itemsize + w.size * w.dtype.itemsize
                    + n * f_out * jnp.dtype(out_dtype).itemsize)
    return pl.pallas_call(
        _linear_kernel,
        grid=(n // tile,),
        in_specs=[pl.BlockSpec((tile, f_in), lambda i: (i, 0)),
                  pl.BlockSpec((f_in, f_out), lambda i: (0, 0))],
        out_specs=pl.BlockSpec((tile, f_out), lambda i: (i, 0)),
        out_shape=jax.ShapeDtypeStruct((n, f_out), out_dtype),
        compiler_params=_params("parallel"),
        cost_estimate=pl.CostEstimate(flops=2 * n * f_in * f_out,
                                      transcendentals=0,
                                      bytes_accessed=bytes_acc),
    )(x, w)


def _tiled_sage_linear(xn, xs, wn, ws, b, *, tile, apply_relu, out_dtype):
    n, f_n = xn.shape
    f_s = xs.shape[1]
    f_out = wn.shape[1]
    kernel = functools.partial(_sage_linear_kernel, apply_relu=apply_relu)
    bytes_acc = int(xn.size * xn.dtype.itemsize + xs.size * xs.dtype.itemsize
                    + wn.size * wn.dtype.itemsize + ws.size * ws.dtype.itemsize
                    + b.size * b.dtype.itemsize
                    + n * f_out * jnp.dtype(out_dtype).itemsize)
    return pl.pallas_call(
        kernel,
        grid=(n // tile,),
        in_specs=[pl.BlockSpec((tile, f_n), lambda i: (i, 0)),
                  pl.BlockSpec((tile, f_s), lambda i: (i, 0)),
                  pl.BlockSpec((f_n, f_out), lambda i: (0, 0)),
                  pl.BlockSpec((f_s, f_out), lambda i: (0, 0)),
                  pl.BlockSpec((tile, f_out), lambda i: (i, 0))],
        out_specs=pl.BlockSpec((tile, f_out), lambda i: (i, 0)),
        out_shape=jax.ShapeDtypeStruct((n, f_out), out_dtype),
        compiler_params=_params("parallel"),
        cost_estimate=pl.CostEstimate(flops=2 * n * (f_n + f_s) * f_out + 2 * n * f_out,
                                      transcendentals=0,
                                      bytes_accessed=bytes_acc),
    )(xn, xs, wn, ws, b)


def _tiled_aggregate(adj, p, *, tile, apply_relu, out_dtype):
    """out = [relu](adj @ p) with the contraction (node) axis tiled by the grid."""
    n = adj.shape[0]
    f = p.shape[1]
    kernel = functools.partial(_agg_kernel, apply_relu=apply_relu)
    bytes_acc = int(adj.size * adj.dtype.itemsize
                    + (n // tile) * p.size * p.dtype.itemsize
                    + n * f * jnp.dtype(out_dtype).itemsize)
    return pl.pallas_call(
        kernel,
        grid=(n // tile, n // tile),
        in_specs=[pl.BlockSpec((tile, tile), lambda i, k: (i, k)),
                  pl.BlockSpec((tile, f), lambda i, k: (k, 0))],
        out_specs=pl.BlockSpec((tile, f), lambda i, k: (i, 0)),
        out_shape=jax.ShapeDtypeStruct((n, f), out_dtype),
        scratch_shapes=[pltpu.VMEM((tile, f), jnp.float32)],
        compiler_params=_params("parallel", "arbitrary"),
        cost_estimate=pl.CostEstimate(flops=2 * n * n * f,
                                      transcendentals=0,
                                      bytes_accessed=bytes_acc),
    )(adj, p)


def _dist_softmax(e, n_real, *, tile, out_dtype):
    """softmax(-pairwise_sq_dist(E rows), axis=1) + 1e-10, two-pass, tiled."""
    n, f = e.shape
    e_b = e.astype(jnp.bfloat16)                  # bf16 MXU operands, rounded once
    e_f = e_b.astype(jnp.float32)
    sq = jnp.sum(e_f * e_f, axis=1)               # squared row norms of bf16 E
    sq_row = sq[:, None]                          # (n, 1) f32
    sq_col = sq[None, :]                          # (1, n) f32
    et = e_b.T                                    # (f, n) bf16, transposed once

    kt = n // tile
    exp_kernel = functools.partial(_dist_exp_kernel, tile=tile, n_real=n_real)
    p_unnorm, row_sum = pl.pallas_call(
        exp_kernel,
        grid=(kt, kt),
        in_specs=[pl.BlockSpec((tile, f), lambda i, j: (i, 0)),
                  pl.BlockSpec((f, tile), lambda i, j: (0, j)),
                  pl.BlockSpec((tile, 1), lambda i, j: (i, 0)),
                  pl.BlockSpec((1, tile), lambda i, j: (0, j))],
        out_specs=[pl.BlockSpec((tile, tile), lambda i, j: (i, j)),
                   pl.BlockSpec((tile, 1), lambda i, j: (i, 0))],
        out_shape=[jax.ShapeDtypeStruct((n, n), jnp.bfloat16),
                   jax.ShapeDtypeStruct((n, 1), jnp.float32)],
        compiler_params=_params("parallel", "arbitrary"),
        cost_estimate=pl.CostEstimate(flops=2 * n * n * f + 6 * n * n,
                                      transcendentals=n * n,
                                      bytes_accessed=int(4 * n * f + 2 * n * n + 8 * n)),
    )(e_b, et, sq_row, sq_col)

    out_bytes = int(2 * n * n + n * n * jnp.dtype(out_dtype).itemsize + 4 * n)
    return pl.pallas_call(
        _dist_norm_kernel,
        grid=(kt, kt),
        in_specs=[pl.BlockSpec((tile, tile), lambda i, j: (i, j)),
                  pl.BlockSpec((tile, 1), lambda i, j: (i, 0))],
        out_specs=pl.BlockSpec((tile, tile), lambda i, j: (i, j)),
        out_shape=jax.ShapeDtypeStruct((n, n), out_dtype),
        compiler_params=_params("parallel", "parallel"),
        cost_estimate=pl.CostEstimate(flops=2 * n * n, transcendentals=n,
                                      bytes_accessed=out_bytes),
    )(p_unnorm, row_sum)


# ----------------------------------------------------------------------------
# Forward pass (GAE_NN.forward). Returns (recons_w, embedding).
# ----------------------------------------------------------------------------
def gae_nn_forward(norm_adj_matrix, data_matrix, params, *, gcn,
                   tile=None, recons_dtype=jnp.float32):
    n, f_in = data_matrix.shape
    npad, t = _geom(n, tile)
    fp_in = _round_up(f_in, _LANE)

    # Pad node and feature axes once in the wrapper (zero padding is inert for
    # every downstream op; padded softmax columns are masked in-kernel).
    adj_b = jnp.zeros((npad, npad), jnp.bfloat16).at[:n, :n].set(
        norm_adj_matrix.astype(jnp.bfloat16))
    x_f32 = jnp.zeros((npad, fp_in), jnp.float32).at[:n, :f_in].set(
        data_matrix.astype(jnp.float32))

    if gcn:
        mid = params["W1"].shape[1]
        emb = params["W2"].shape[1]
        fp_mid = _round_up(mid, _LANE)
        fp_emb = _round_up(emb, _LANE)
        w1 = jnp.zeros((fp_in, fp_mid), jnp.float32).at[:f_in, :mid].set(params["W1"])
        w2 = jnp.zeros((fp_mid, fp_emb), jnp.bfloat16).at[:mid, :emb].set(
            params["W2"].astype(jnp.bfloat16))

        p1 = _tiled_linear(x_f32, w1, tile=t, out_dtype=jnp.bfloat16)       # X @ W1
        h1 = _tiled_aggregate(adj_b, p1, tile=t, apply_relu=True,
                              out_dtype=jnp.bfloat16)                       # relu(A @ .)
        p2 = _tiled_linear(h1, w2, tile=t, out_dtype=jnp.bfloat16)          # H1 @ W2
        e_full = _tiled_aggregate(adj_b, p2, tile=t, apply_relu=False,
                                  out_dtype=jnp.float32)                    # A @ .
    else:
        mid = params["W1_neigh"].shape[1]
        emb = params["W2_neigh"].shape[1]
        fp_mid = _round_up(mid, _LANE)
        fp_emb = _round_up(emb, _LANE)
        x_b = x_f32.astype(jnp.bfloat16)
        w1n = jnp.zeros((fp_in, fp_mid), jnp.bfloat16).at[:f_in, :mid].set(
            params["W1_neigh"].astype(jnp.bfloat16))
        w1s = jnp.zeros((fp_in, fp_mid), jnp.bfloat16).at[:f_in, :mid].set(
            params["W1_self"].astype(jnp.bfloat16))
        b1 = jnp.zeros((npad, fp_mid), jnp.float32).at[:n, :mid].set(params["W1_bias"])
        w2n = jnp.zeros((fp_mid, fp_emb), jnp.bfloat16).at[:mid, :emb].set(
            params["W2_neigh"].astype(jnp.bfloat16))
        w2s = jnp.zeros((fp_mid, fp_emb), jnp.bfloat16).at[:mid, :emb].set(
            params["W2_self"].astype(jnp.bfloat16))
        b2 = jnp.zeros((npad, fp_emb), jnp.float32).at[:n, :emb].set(params["W2_bias"])

        # A @ (X @ W1n) == (A @ X) @ W1n: aggregate raw features once, then fuse
        # neighbor-transform + self-transform + bias + relu into one kernel.
        ax = _tiled_aggregate(adj_b, x_b, tile=t, apply_relu=False,
                              out_dtype=jnp.bfloat16)                       # A @ X
        h1 = _tiled_sage_linear(ax, x_b, w1n, w1s, b1, tile=t,
                                apply_relu=True, out_dtype=jnp.bfloat16)
        ah1 = _tiled_aggregate(adj_b, h1, tile=t, apply_relu=False,
                               out_dtype=jnp.bfloat16)                      # A @ H1
        e_full = _tiled_sage_linear(ah1, h1, w2n, w2s, b2, tile=t,
                                    apply_relu=True, out_dtype=jnp.float32)

    recons = _dist_softmax(e_full, n, tile=t, out_dtype=recons_dtype)
    return recons[:n, :n], e_full[:n, :emb]


# ----------------------------------------------------------------------------
# Deterministic parameter init (mirrors get_weight_initial: U[-b, b], b=sqrt(6/(d0+d1)))
# ----------------------------------------------------------------------------
def _weight_initial(key, shape):
    bound = jnp.sqrt(6.0 / (shape[0] + shape[1]))
    return jax.random.uniform(key, shape, jnp.float32, minval=-bound, maxval=bound)


def make_params(key, n, input_dim, mid_dim, embedding_dim):
    keys = jax.random.split(key, 8)
    return {
        "W1": _weight_initial(keys[0], (input_dim, mid_dim)),
        "W2": _weight_initial(keys[1], (mid_dim, embedding_dim)),
        "W1_neigh": _weight_initial(keys[2], (input_dim, mid_dim)),
        "W1_self": _weight_initial(keys[3], (input_dim, mid_dim)),
        "W1_bias": _weight_initial(keys[4], (n, mid_dim)),
        "W2_neigh": _weight_initial(keys[5], (mid_dim, embedding_dim)),
        "W2_self": _weight_initial(keys[6], (mid_dim, embedding_dim)),
        "W2_bias": _weight_initial(keys[7], (n, embedding_dim)),
    }


# ----------------------------------------------------------------------------
# Main
# ----------------------------------------------------------------------------
if __name__ == "__main__":
    INPUT_DIM, MID_DIM, EMB_DIM = 32, 16, 8   # layers = [32, 16, 8]

    def make_case(seed, n_nodes):
        kk = jax.random.PRNGKey(seed)
        ka, kd, kp = jax.random.split(kk, 3)
        aa = jax.random.uniform(ka, (n_nodes, n_nodes), jnp.float32)
        aa = 0.5 * (aa + aa.T) + jnp.eye(n_nodes, dtype=jnp.float32)
        adj = aa / jnp.sum(aa, axis=1, keepdims=True)
        xx = jax.random.normal(kd, (n_nodes, INPUT_DIM), jnp.float32)
        pp = make_params(kp, n_nodes, INPUT_DIM, MID_DIM, EMB_DIM)
        return adj, xx, pp

    def reference(adj, x, p, gcn):
        if gcn:
            h1 = jnp.maximum(adj @ (x @ p["W1"]), 0.0)
            e = adj @ (h1 @ p["W2"])
        else:
            e1 = adj @ (x @ p["W1_neigh"]) + x @ p["W1_self"] + p["W1_bias"]
            e1 = jnp.maximum(e1, 0.0)
            e = (adj @ e1) @ p["W2_neigh"] + e1 @ p["W2_self"] + p["W2_bias"]
            e = jnp.maximum(e, 0.0)
        sq = jnp.sum(e * e, axis=1, keepdims=True)
        d = jnp.maximum(sq + sq.T - 2.0 * (e @ e.T), 0.0)
        return jax.nn.softmax(-d, axis=1) + 1e-10, e

    # (seed, N, gcn, tile): the last case exercises the padded-N / multi-tile /
    # K-accumulation / masked-column paths with a small multi-block grid.
    cases = [(0, 16, True, None), (0, 16, False, None), (1, 200, False, 128)]

    for seed, n_nodes, gcn_flag, tile in cases:
        adj, x, p = make_case(seed, n_nodes)
        fwd = jax.jit(functools.partial(gae_nn_forward, gcn=gcn_flag, tile=tile))
        recons, emb = jax.block_until_ready(fwd(adj, x, p))

        assert recons.shape == (n_nodes, n_nodes) and emb.shape == (n_nodes, EMB_DIM)

        rec_ref, emb_ref = reference(adj, x, p, gcn_flag)
        # Loose checks: bf16 adjacency / cross-term / intermediates and the
        # approximate EUP reciprocal introduce small deviations from f32.
        assert float(jnp.max(jnp.abs(jnp.sum(recons, axis=1) - 1.0))) < 3e-2
        assert float(jnp.max(jnp.abs(recons - rec_ref))) < 5e-2
        scale = 1.0 + float(jnp.max(jnp.abs(emb_ref)))
        assert float(jnp.max(jnp.abs(emb - emb_ref))) < 5e-2 * scale

    print("KERNEL_OK")
</pallas_src>

<mosaic_0001>
module attributes {stable_mosaic.version = 11 : i64} {
  func.func @_linear_kernel(%arg0: i32, %arg1: memref<16x128xf32, #tpu.memory_space<vmem>>, %arg2: memref<128x128xf32, #tpu.memory_space<vmem>>, %arg3: memref<16x128xbf16, #tpu.memory_space<vmem>>) attributes {dimension_semantics = [#tpu.dimension_semantics<parallel>], iteration_bounds = array<i64: 1>, scalar_prefetch = 0 : i64, scratch_operands = 0 : i64, tpu.core_type = #tpu.core_type<tc>, window_params = [{transform_indices = @transform_0, window_bounds = array<i64: 16, 128>}, {pipeline_mode = #tpu.pipeline_mode<synchronous>, transform_indices = @transform_1, window_bounds = array<i64: 128, 128>}, {transform_indices = @transform_2, window_bounds = array<i64: 16, 128>}]} {
    %c0 = arith.constant 0 : index
    %c0_0 = arith.constant 0 : index
    %0 = vector.load %arg1[%c0, %c0_0] : memref<16x128xf32, #tpu.memory_space<vmem>>, vector<16x128xf32>
    %c0_1 = arith.constant 0 : index
    %c0_2 = arith.constant 0 : index
    %1 = vector.load %arg2[%c0_1, %c0_2] : memref<128x128xf32, #tpu.memory_space<vmem>>, vector<128x128xf32>
    %cst = arith.constant dense<0.000000e+00> : vector<16x128xf32>
    %2 = tpu.matmul %0, %1, %cst {dimension_numbers = #tpu.dot_dimension_numbers<[1], [0], [0], [1], [0, 0, 1, 1], [], []>} : vector<16x128xf32>, vector<128x128xf32>, vector<16x128xf32> -> vector<16x128xf32>
    %3 = arith.truncf %2 : vector<16x128xf32> to vector<16x128xbf16>
    %c0_3 = arith.constant 0 : index
    %c0_4 = arith.constant 0 : index
    %4 = vector.load %arg3[%c0_3, %c0_4] : memref<16x128xbf16, #tpu.memory_space<vmem>>, vector<16x128xbf16>
    tpu.vector_store %arg3[%c0_3, %c0_4], %3 {strides = array<i32>} : memref<16x128xbf16, #tpu.memory_space<vmem>>, vector<16x128xbf16>,
    return
  }
  func.func @transform_0(%arg0: i32) -> (i32, i32) {
    %c0_i32 = arith.constant 0 : i32
    %c0_i32_0 = arith.constant 0 : i32
    return %arg0, %c0_i32 : i32, i32
  }
  func.func @transform_1(%arg0: i32) -> (i32, i32) {
    %c0_i32 = arith.constant 0 : i32
    %c0_i32_0 = arith.constant 0 : i32
    %c0_i32_1 = arith.constant 0 : i32
    return %c0_i32, %c0_i32_0 : i32, i32
  }
  func.func @transform_2(%arg0: i32) -> (i32, i32) {
    %c0_i32 = arith.constant 0 : i32
    %c0_i32_0 = arith.constant 0 : i32
    return %arg0, %c0_i32 : i32, i32
  }
}

module attributes {stable_mosaic.version = 11 : i64} {
  func.func @_agg_kernel(%arg0: i32, %arg1: i32, %arg2: memref<16x16xbf16, #tpu.memory_space<vmem>>, %arg3: memref<16x128xbf16, #tpu.memory_space<vmem>>, %arg4: memref<16x128xbf16, #tpu.memory_space<vmem>>, %arg5: memref<16x128xf32, #tpu.memory_space<vmem>>) attributes {dimension_semantics = [#tpu.dimension_semantics<parallel>, #tpu.dimension_semantics<arbitrary>], iteration_bounds = array<i64: 1, 1>, scalar_prefetch = 0 : i64, scratch_operands = 1 : i64, tpu.core_type = #tpu.core_type<tc>, window_params = [{transform_indices = @transform_0, window_bounds = array<i64: 16, 16>}, {transform_indices = @transform_1, window_bounds = array<i64: 16, 128>}, {transform_indices = @transform_2, window_bounds = array<i64: 16, 128>}]} {
    %c0_i32 = arith.constant 0 : i32
    %0 = arith.cmpi eq, %arg1, %c0_i32 : i32
    %1 = arith.extui %0 : i1 to i32
    %c0_i32_0 = arith.constant 0 : i32
    %2 = arith.cmpi ne, %1, %c0_i32_0 : i32
    scf.if %2 {
      %cst_10 = arith.constant 0.000000e+00 : f32
      %12 = vector.broadcast %cst_10 : f32 to vector<16x128xf32>
      %c0_11 = arith.constant 0 : index
      %c0_12 = arith.constant 0 : index
      %13 = vector.load %arg5[%c0_11, %c0_12] : memref<16x128xf32, #tpu.memory_space<vmem>>, vector<16x128xf32>
      tpu.vector_store %arg5[%c0_11, %c0_12], %12 {strides = array<i32>} : memref<16x128xf32, #tpu.memory_space<vmem>>, vector<16x128xf32>,
    } else {
    }
    %c0 = arith.constant 0 : index
    %c0_1 = arith.constant 0 : index
    %3 = vector.load %arg5[%c0, %c0_1] : memref<16x128xf32, #tpu.memory_space<vmem>>, vector<16x128xf32>
    %c0_2 = arith.constant 0 : index
    %c0_3 = arith.constant 0 : index
    %4 = vector.load %arg2[%c0_2, %c0_3] : memref<16x16xbf16, #tpu.memory_space<vmem>>, vector<16x16xbf16>
    %c0_4 = arith.constant 0 : index
    %c0_5 = arith.constant 0 : index
    %5 = vector.load %arg3[%c0_4, %c0_5] : memref<16x128xbf16, #tpu.memory_space<vmem>>, vector<16x128xbf16>
    %cst = arith.constant dense<0.000000e+00> : vector<16x128xf32>
    %6 = tpu.matmul %4, %5, %cst {dimension_numbers = #tpu.dot_dimension_numbers<[1], [0], [0], [1], [0, 0, 1, 1], [], []>} : vector<16x16xbf16>, vector<16x128xbf16>, vector<16x128xf32> -> vector<16x128xf32>
    %7 = arith.addf %3, %6 : vector<16x128xf32>
    %c0_6 = arith.constant 0 : index
    %c0_7 = arith.constant 0 : index
    %8 = vector.load %arg5[%c0_6, %c0_7] : memref<16x128xf32, #tpu.memory_space<vmem>>, vector<16x128xf32>
    tpu.vector_store %arg5[%c0_6, %c0_7], %7 {strides = array<i32>} : memref<16x128xf32, #tpu.memory_space<vmem>>, vector<16x128xf32>,
    %c0_i32_8 = arith.constant 0 : i32
    %9 = arith.cmpi eq, %arg1, %c0_i32_8 : i32
    %10 = arith.extui %9 : i1 to i32
    %c0_i32_9 = arith.constant 0 : i32
    %11 = arith.cmpi ne, %10, %c0_i32_9 : i32
    scf.if %11 {
      %c0_10 = arith.constant 0 : index
      %c0_11 = arith.constant 0 : index
      %12 = vector.load %arg5[%c0_10, %c0_11] : memref<16x128xf32, #tpu.memory_space<vmem>>, vector<16x128xf32>
      %cst_12 = arith.constant 0.000000e+00 : f32
      %13 = vector.broadcast %cst_12 : f32 to vector<16x128xf32>
      %14 = arith.maximumf %12, %13 : vector<16x128xf32>
      %15 = arith.truncf %14 : vector<16x128xf32> to vector<16x128xbf16>
      %c0_13 = arith.constant 0 : index
      %c0_14 = arith.constant 0 : index
      %16 = vector.load %arg4[%c0_13, %c0_14] : memref<16x128xbf16, #tpu.memory_space<vmem>>, vector<16x128xbf16>
      tpu.vector_store %arg4[%c0_13, %c0_14], %15 {strides = array<i32>} : memref<16x128xbf16, #tpu.memory_space<vmem>>, vector<16x128xbf16>,
    } else {
    }
    return
  }
  func.func @transform_0(%arg0: i32, %arg1: i32) -> (i32, i32) {
    %c0_i32 = arith.constant 0 : i32
    return %arg0, %arg1 : i32, i32
  }
  func.func @transform_1(%arg0: i32, %arg1: i32) -> (i32, i32) {
    %c0_i32 = arith.constant 0 : i32
    %c0_i32_0 = arith.constant 0 : i32
    return %arg1, %c0_i32 : i32, i32
  }
  func.func @transform_2(%arg0: i32, %arg1: i32) -> (i32, i32) {
    %c0_i32 = arith.constant 0 : i32
    %c0_i32_0 = arith.constant 0 : i32
    return %arg0, %c0_i32 : i32, i32
  }
}

module attributes {stable_mosaic.version = 11 : i64} {
  func.func @_linear_kernel(%arg0: i32, %arg1: memref<16x128xbf16, #tpu.memory_space<vmem>>, %arg2: memref<128x128xbf16, #tpu.memory_space<vmem>>, %arg3: memref<16x128xbf16, #tpu.memory_space<vmem>>) attributes {dimension_semantics = [#tpu.dimension_semantics<parallel>], iteration_bounds = array<i64: 1>, scalar_prefetch = 0 : i64, scratch_operands = 0 : i64, tpu.core_type = #tpu.core_type<tc>, window_params = [{transform_indices = @transform_0, window_bounds = array<i64: 16, 128>}, {pipeline_mode = #tpu.pipeline_mode<synchronous>, transform_indices = @transform_1, window_bounds = array<i64: 128, 128>}, {transform_indices = @transform_2, window_bounds = array<i64: 16, 128>}]} {
    %c0 = arith.constant 0 : index
    %c0_0 = arith.constant 0 : index
    %0 = vector.load %arg1[%c0, %c0_0] : memref<16x128xbf16, #tpu.memory_space<vmem>>, vector<16x128xbf16>
    %c0_1 = arith.constant 0 : index
    %c0_2 = arith.constant 0 : index
    %1 = vector.load %arg2[%c0_1, %c0_2] : memref<128x128xbf16, #tpu.memory_space<vmem>>, vector<128x128xbf16>
    %cst = arith.constant dense<0.000000e+00> : vector<16x128xf32>
    %2 = tpu.matmul %0, %1, %cst {dimension_numbers = #tpu.dot_dimension_numbers<[1], [0], [0], [1], [0, 0, 1, 1], [], []>} : vector<16x128xbf16>, vector<128x128xbf16>, vector<16x128xf32> -> vector<16x128xf32>
    %3 = arith.truncf %2 : vector<16x128xf32> to vector<16x128xbf16>
    %c0_3 = arith.constant 0 : index
    %c0_4 = arith.constant 0 : index
    %4 = vector.load %arg3[%c0_3, %c0_4] : memref<16x128xbf16, #tpu.memory_space<vmem>>, vector<16x128xbf16>
    tpu.vector_store %arg3[%c0_3, %c0_4], %3 {strides = array<i32>} : memref<16x128xbf16, #tpu.memory_space<vmem>>, vector<16x128xbf16>,
    return
  }
  func.func @transform_0(%arg0: i32) -> (i32, i32) {
    %c0_i32 = arith.constant 0 : i32
    %c0_i32_0 = arith.constant 0 : i32
    return %arg0, %c0_i32 : i32, i32
  }
  func.func @transform_1(%arg0: i32) -> (i32, i32) {
    %c0_i32 = arith.constant 0 : i32
    %c0_i32_0 = arith.constant 0 : i32
    %c0_i32_1 = arith.constant 0 : i32
    return %c0_i32, %c0_i32_0 : i32, i32
  }
  func.func @transform_2(%arg0: i32) -> (i32, i32) {
    %c0_i32 = arith.constant 0 : i32
    %c0_i32_0 = arith.constant 0 : i32
    return %arg0, %c0_i32 : i32, i32
  }
}

module attributes {stable_mosaic.version = 11 : i64} {
  func.func @_agg_kernel(%arg0: i32, %arg1: i32, %arg2: memref<16x16xbf16, #tpu.memory_space<vmem>>, %arg3: memref<16x128xbf16, #tpu.memory_space<vmem>>, %arg4: memref<16x128xf32, #tpu.memory_space<vmem>>, %arg5: memref<16x128xf32, #tpu.memory_space<vmem>>) attributes {dimension_semantics = [#tpu.dimension_semantics<parallel>, #tpu.dimension_semantics<arbitrary>], iteration_bounds = array<i64: 1, 1>, scalar_prefetch = 0 : i64, scratch_operands = 1 : i64, tpu.core_type = #tpu.core_type<tc>, window_params = [{transform_indices = @transform_0, window_bounds = array<i64: 16, 16>}, {transform_indices = @transform_1, window_bounds = array<i64: 16, 128>}, {transform_indices = @transform_2, window_bounds = array<i64: 16, 128>}]} {
    %c0_i32 = arith.constant 0 : i32
    %0 = arith.cmpi eq, %arg1, %c0_i32 : i32
    %1 = arith.extui %0 : i1 to i32
    %c0_i32_0 = arith.constant 0 : i32
    %2 = arith.cmpi ne, %1, %c0_i32_0 : i32
    scf.if %2 {
      %cst_10 = arith.constant 0.000000e+00 : f32
      %12 = vector.broadcast %cst_10 : f32 to vector<16x128xf32>
      %c0_11 = arith.constant 0 : index
      %c0_12 = arith.constant 0 : index
      %13 = vector.load %arg5[%c0_11, %c0_12] : memref<16x128xf32, #tpu.memory_space<vmem>>, vector<16x128xf32>
      tpu.vector_store %arg5[%c0_11, %c0_12], %12 {strides = array<i32>} : memref<16x128xf32, #tpu.memory_space<vmem>>, vector<16x128xf32>,
    } else {
    }
    %c0 = arith.constant 0 : index
    %c0_1 = arith.constant 0 : index
    %3 = vector.load %arg5[%c0, %c0_1] : memref<16x128xf32, #tpu.memory_space<vmem>>, vector<16x128xf32>
    %c0_2 = arith.constant 0 : index
    %c0_3 = arith.constant 0 : index
    %4 = vector.load %arg2[%c0_2, %c0_3] : memref<16x16xbf16, #tpu.memory_space<vmem>>, vector<16x16xbf16>
    %c0_4 = arith.constant 0 : index
    %c0_5 = arith.constant 0 : index
    %5 = vector.load %arg3[%c0_4, %c0_5] : memref<16x128xbf16, #tpu.memory_space<vmem>>, vector<16x128xbf16>
    %cst = arith.constant dense<0.000000e+00> : vector<16x128xf32>
    %6 = tpu.matmul %4, %5, %cst {dimension_numbers = #tpu.dot_dimension_numbers<[1], [0], [0], [1], [0, 0, 1, 1], [], []>} : vector<16x16xbf16>, vector<16x128xbf16>, vector<16x128xf32> -> vector<16x128xf32>
    %7 = arith.addf %3, %6 : vector<16x128xf32>
    %c0_6 = arith.constant 0 : index
    %c0_7 = arith.constant 0 : index
    %8 = vector.load %arg5[%c0_6, %c0_7] : memref<16x128xf32, #tpu.memory_space<vmem>>, vector<16x128xf32>
    tpu.vector_store %arg5[%c0_6, %c0_7], %7 {strides = array<i32>} : memref<16x128xf32, #tpu.memory_space<vmem>>, vector<16x128xf32>,
    %c0_i32_8 = arith.constant 0 : i32
    %9 = arith.cmpi eq, %arg1, %c0_i32_8 : i32
    %10 = arith.extui %9 : i1 to i32
    %c0_i32_9 = arith.constant 0 : i32
    %11 = arith.cmpi ne, %10, %c0_i32_9 : i32
    scf.if %11 {
      %c0_10 = arith.constant 0 : index
      %c0_11 = arith.constant 0 : index
      %12 = vector.load %arg5[%c0_10, %c0_11] : memref<16x128xf32, #tpu.memory_space<vmem>>, vector<16x128xf32>
      %c0_12 = arith.constant 0 : index
      %c0_13 = arith.constant 0 : index
      %13 = vector.load %arg4[%c0_12, %c0_13] : memref<16x128xf32, #tpu.memory_space<vmem>>, vector<16x128xf32>
      tpu.vector_store %arg4[%c0_12, %c0_13], %12 {strides = array<i32>} : memref<16x128xf32, #tpu.memory_space<vmem>>, vector<16x128xf32>,
    } else {
    }
    return
  }
  func.func @transform_0(%arg0: i32, %arg1: i32) -> (i32, i32) {
    %c0_i32 = arith.constant 0 : i32
    return %arg0, %arg1 : i32, i32
  }
  func.func @transform_1(%arg0: i32, %arg1: i32) -> (i32, i32) {
    %c0_i32 = arith.constant 0 : i32
    %c0_i32_0 = arith.constant 0 : i32
    return %arg1, %c0_i32 : i32, i32
  }
  func.func @transform_2(%arg0: i32, %arg1: i32) -> (i32, i32) {
    %c0_i32 = arith.constant 0 : i32
    %c0_i32_0 = arith.constant 0 : i32
    return %arg0, %c0_i32 : i32, i32
  }
}

module attributes {stable_mosaic.version = 11 : i64} {
  func.func @_dist_exp_kernel(%arg0: i32, %arg1: i32, %arg2: memref<16x128xbf16, #tpu.memory_space<vmem>>, %arg3: memref<128x16xbf16, #tpu.memory_space<vmem>>, %arg4: memref<16x1xf32, #tpu.memory_space<vmem>>, %arg5: memref<1x16xf32, #tpu.memory_space<vmem>>, %arg6: memref<16x16xbf16, #tpu.memory_space<vmem>>, %arg7: memref<16x1xf32, #tpu.memory_space<vmem>>) attributes {dimension_semantics = [#tpu.dimension_semantics<parallel>, #tpu.dimension_semantics<arbitrary>], iteration_bounds = array<i64: 1, 1>, scalar_prefetch = 0 : i64, scratch_operands = 0 : i64, tpu.core_type = #tpu.core_type<tc>, window_params = [{transform_indices = @transform_0, window_bounds = array<i64: 16, 128>}, {transform_indices = @transform_1, window_bounds = array<i64: 128, 16>}, {transform_indices = @transform_2, window_bounds = array<i64: 16, 1>}, {transform_indices = @transform_3, window_bounds = array<i64: 1, 16>}, {transform_indices = @transform_4, window_bounds = array<i64: 16, 16>}, {transform_indices = @transform_5, window_bounds = array<i64: 16, 1>}]} {
    %c0 = arith.constant 0 : index
    %c0_0 = arith.constant 0 : index
    %0 = vector.load %arg2[%c0, %c0_0] : memref<16x128xbf16, #tpu.memory_space<vmem>>, vector<16x128xbf16>
    %c0_1 = arith.constant 0 : index
    %c0_2 = arith.constant 0 : index
    %1 = vector.load %arg3[%c0_1, %c0_2] : memref<128x16xbf16, #tpu.memory_space<vmem>>, vector<128x16xbf16>
    %cst = arith.constant dense<0.000000e+00> : vector<16x16xf32>
    %2 = tpu.matmul %0, %1, %cst {dimension_numbers = #tpu.dot_dimension_numbers<[1], [0], [0], [1], [0, 0, 1, 1], [], []>} : vector<16x128xbf16>, vector<128x16xbf16>, vector<16x16xf32> -> vector<16x16xf32>
    %c0_3 = arith.constant 0 : index
    %c0_4 = arith.constant 0 : index
    %3 = vector.load %arg4[%c0_3, %c0_4] : memref<16x1xf32, #tpu.memory_space<vmem>>, vector<16x1xf32>
    %c0_5 = arith.constant 0 : index
    %c0_6 = arith.constant 0 : index
    %4 = vector.load %arg5[%c0_5, %c0_6] : memref<1x16xf32, #tpu.memory_space<vmem>>, vector<1x16xf32>
    %5 = vector.broadcast %3 : vector<16x1xf32> to vector<16x16xf32>
    %6 = vector.broadcast %4 : vector<1x16xf32> to vector<16x16xf32>
    %7 = arith.addf %5, %6 : vector<16x16xf32>
    %cst_7 = arith.constant 2.000000e+00 : f32
    %8 = vector.broadcast %cst_7 : f32 to vector<16x16xf32>
    %9 = arith.mulf %8, %2 : vector<16x16xf32>
    %10 = arith.subf %7, %9 : vector<16x16xf32>
    %cst_8 = arith.constant 0.000000e+00 : f32
    %11 = vector.broadcast %cst_8 : f32 to vector<16x16xf32>
    %12 = arith.maximumf %10, %11 : vector<16x16xf32>
    %cst_9 = arith.constant 0.000000e+00 : f32
    %13 = vector.broadcast %cst_9 : f32 to vector<16x16xf32>
    %14 = arith.subf %13, %12 : vector<16x16xf32>
    %15 = math.exp %14 : vector<16x16xf32>
    %c16_i32 = arith.constant 16 : i32
    %16 = arith.muli %arg1, %c16_i32 : i32
    %17 = tpu.iota {dimensions = array<i32: 1>} : vector<16x16xi32>
    %18 = vector.broadcast %16 : i32 to vector<16x16xi32>
    %19 = arith.addi %18, %17 : vector<16x16xi32>
    %c16_i32_10 = arith.constant 16 : i32
    %20 = vector.broadcast %c16_i32_10 : i32 to vector<16x16xi32>
    %21 = arith.cmpi slt, %19, %20 : vector<16x16xi32>
    %cst_11 = arith.constant 0.000000e+00 : f32
    %22 = vector.broadcast %cst_11 : f32 to vector<16x16xf32>
    %23 = arith.select %21, %15, %22 : vector<16x16xi1>, vector<16x16xf32>
    %24 = arith.truncf %23 : vector<16x16xf32> to vector<16x16xbf16>
    %c0_12 = arith.constant 0 : index
    %c0_13 = arith.constant 0 : index
    %25 = vector.load %arg6[%c0_12, %c0_13] : memref<16x16xbf16, #tpu.memory_space<vmem>>, vector<16x16xbf16>
    tpu.vector_store %arg6[%c0_12, %c0_13], %24 {strides = array<i32>} : memref<16x16xbf16, #tpu.memory_space<vmem>>, vector<16x16xbf16>,
    %c0_i32 = arith.constant 0 : i32
    %26 = arith.cmpi eq, %arg1, %c0_i32 : i32
    %27 = arith.extui %26 : i1 to i32
    %c0_i32_14 = arith.constant 0 : i32
    %28 = arith.cmpi ne, %27, %c0_i32_14 : i32
    scf.if %28 {
      %cst_20 = arith.constant 0.000000e+00 : f32
      %35 = vector.broadcast %cst_20 : f32 to vector<16x1xf32>
      %c0_21 = arith.constant 0 : index
      %c0_22 = arith.constant 0 : index
      %36 = vector.load %arg7[%c0_21, %c0_22] : memref<16x1xf32, #tpu.memory_space<vmem>>, vector<16x1xf32>
      tpu.vector_store %arg7[%c0_21, %c0_22], %35 {strides = array<i32>} : memref<16x1xf32, #tpu.memory_space<vmem>>, vector<16x1xf32>,
    } else {
    }
    %c0_15 = arith.constant 0 : index
    %c0_16 = arith.constant 0 : index
    %29 = vector.load %arg7[%c0_15, %c0_16] : memref<16x1xf32, #tpu.memory_space<vmem>>, vector<16x1xf32>
    %30 = arith.extf %24 : vector<16x16xbf16> to vector<16x16xf32>
    %cst_17 = arith.constant dense<0.000000e+00> : vector<16xf32>
    %31 = vector.multi_reduction <add>, %30, %cst_17 [1] : vector<16x16xf32> to vector<16xf32>
    %32 = vector.shape_cast %31 : vector<16xf32> to vector<16x1xf32>
    %33 = arith.addf %29, %32 : vector<16x1xf32>
    %c0_18 = arith.constant 0 : index
    %c0_19 = arith.constant 0 : index
    %34 = vector.load %arg7[%c0_18, %c0_19] : memref<16x1xf32, #tpu.memory_space<vmem>>, vector<16x1xf32>
    tpu.vector_store %arg7[%c0_18, %c0_19], %33 {strides = array<i32>} : memref<16x1xf32, #tpu.memory_space<vmem>>, vector<16x1xf32>,
    return
  }
  func.func @transform_0(%arg0: i32, %arg1: i32) -> (i32, i32) {
    %c0_i32 = arith.constant 0 : i32
    %c0_i32_0 = arith.constant 0 : i32
    return %arg0, %c0_i32 : i32, i32
  }
  func.func @transform_1(%arg0: i32, %arg1: i32) -> (i32, i32) {
    %c0_i32 = arith.constant 0 : i32
    %c0_i32_0 = arith.constant 0 : i32
    return %c0_i32, %arg1 : i32, i32
  }
  func.func @transform_2(%arg0: i32, %arg1: i32) -> (i32, i32) {
    %c0_i32 = arith.constant 0 : i32
    %c0_i32_0 = arith.constant 0 : i32
    return %arg0, %c0_i32 : i32, i32
  }
  func.func @transform_3(%arg0: i32, %arg1: i32) -> (i32, i32) {
    %c0_i32 = arith.constant 0 : i32
    %c0_i32_0 = arith.constant 0 : i32
    return %c0_i32, %arg1 : i32, i32
  }
  func.func @transform_4(%arg0: i32, %arg1: i32) -> (i32, i32) {
    %c0_i32 = arith.constant 0 : i32
    return %arg0, %arg1 : i32, i32
  }
  func.func @transform_5(%arg0: i32, %arg1: i32) -> (i32, i32) {
    %c0_i32 = arith.constant 0 : i32
    %c0_i32_0 = arith.constant 0 : i32
    return %arg0, %c0_i32 : i32, i32
  }
}

module attributes {stable_mosaic.version = 11 : i64} {
  func.func @_dist_norm_kernel(%arg0: i32, %arg1: i32, %arg2: memref<16x16xbf16, #tpu.memory_space<vmem>>, %arg3: memref<16x1xf32, #tpu.memory_space<vmem>>, %arg4: memref<16x16xf32, #tpu.memory_space<vmem>>) attributes {dimension_semantics = [#tpu.dimension_semantics<parallel>, #tpu.dimension_semantics<parallel>], iteration_bounds = array<i64: 1, 1>, scalar_prefetch = 0 : i64, scratch_operands = 0 : i64, tpu.core_type = #tpu.core_type<tc>, window_params = [{transform_indices = @transform_0, window_bounds = array<i64: 16, 16>}, {transform_indices = @transform_1, window_bounds = array<i64: 16, 1>}, {transform_indices = @transform_2, window_bounds = array<i64: 16, 16>}]} {
    %c0 = arith.constant 0 : index
    %c0_0 = arith.constant 0 : index
    %0 = vector.load %arg3[%c0, %c0_0] : memref<16x1xf32, #tpu.memory_space<vmem>>, vector<16x1xf32>
    %1 = tpu.reciprocal %0 {approx = true} : vector<16x1xf32> -> vector<16x1xf32>
    %c0_1 = arith.constant 0 : index
    %c0_2 = arith.constant 0 : index
    %2 = vector.load %arg2[%c0_1, %c0_2] : memref<16x16xbf16, #tpu.memory_space<vmem>>, vector<16x16xbf16>
    %3 = arith.extf %2 : vector<16x16xbf16> to vector<16x16xf32>
    %4 = vector.broadcast %1 : vector<16x1xf32> to vector<16x16xf32>
    %5 = arith.mulf %3, %4 : vector<16x16xf32>
    %cst = arith.constant 1.000000e-10 : f32
    %6 = vector.broadcast %cst : f32 to vector<16x16xf32>
    %7 = arith.addf %5, %6 : vector<16x16xf32>
    %c0_3 = arith.constant 0 : index
    %c0_4 = arith.constant 0 : index
    %8 = vector.load %arg4[%c0_3, %c0_4] : memref<16x16xf32, #tpu.memory_space<vmem>>, vector<16x16xf32>
    tpu.vector_store %arg4[%c0_3, %c0_4], %7 {strides = array<i32>} : memref<16x16xf32, #tpu.memory_space<vmem>>, vector<16x16xf32>,
    return
  }
  func.func @transform_0(%arg0: i32, %arg1: i32) -> (i32, i32) {
    %c0_i32 = arith.constant 0 : i32
    return %arg0, %arg1 : i32, i32
  }
  func.func @transform_1(%arg0: i32, %arg1: i32) -> (i32, i32) {
    %c0_i32 = arith.constant 0 : i32
    %c0_i32_0 = arith.constant 0 : i32
    return %arg0, %c0_i32 : i32, i32
  }
  func.func @transform_2(%arg0: i32, %arg1: i32) -> (i32, i32) {
    %c0_i32 = arith.constant 0 : i32
    return %arg0, %arg1 : i32, i32
  }
}

</mosaic_0001>

<bundles_post_ra>
// kernel: gae_nn_forward.7
= control target key start
LH: loop header
LB: loop body
LE: loop exit
PB: predicated region body
PF: predicated region fallthrough
CT: control target
= control target key end

     0   :  { %vm35_vm0 = vcmask 130048   ;;  %s112_s1 = inlined_call_operand.vmem [shape: bf16[16,128], index: 1, kind: input, shape index: {}]   ;;  %s113_s0 = inlined_call_operand.vmem [shape: bf16[16,16], index: 0, kind: input, shape index: {}]   ;;  %s114_s2 = inlined_call_operand.vmem [shape: bf16[16,128], index: 2, kind: output, shape index: {}]  }
   0x1   :  { %v82_v0 = vld [vmem:[%s112_s1] sm:$0xff] }
   0x2   :  { %v81_v1 = vld [vmem:[%s113_s0] sm:$0xff]  ;;  %46 = vmatpush.bf16.msra.mxu0 %v82_v0 }
   0x5   :  { %80 = vmatmul.msk.bf16.vlgmr.msra.gmra.mxu0 %vm35_vm0, %v81_v1 }
  0x82   :  { %v48_v2 = vpop.f32.mrf.mxu0 }
  0x83   :  { %v62_v4 = vmax.f32 %v48_v2, 0.0 }
  0x8a   :  { %v50_v3 = vpop.f32.mrf.mxu0 }
  0x8b   :  { %v63_v5 = vmax.f32 %v50_v3, 0.0 }
  0x8d   :  { %v86_v6 = vpack.c.bf16 %v63_v5, %v62_v4 }
  0x8f   :  { %87 = vst [vmem:[%s114_s2] sm:$0xff] %v86_v6  }

// kernel: gae_nn_forward.8
= control target key start
LH: loop header
LB: loop body
LE: loop exit
PB: predicated region body
PF: predicated region fallthrough
CT: control target
= control target key end

     0   :  { %s200_s1 = inlined_call_operand.vmem [shape: bf16[128,128], index: 1, kind: input, shape index: {}]   ;;  %s201_s0 = inlined_call_operand.vmem [shape: bf16[16,128], index: 0, kind: input, shape index: {}]   ;;  %s202_s2 = inlined_call_operand.vmem [shape: bf16[16,128], index: 2, kind: output, shape index: {}]  }
   0x1   :  { %v149_v0 = vld [vmem:[%s200_s1 + $0x38] sm:$0xff]  ;;  %v148_v1 = vld [vmem:[%s200_s1 + $0x30] sm:$0xff]  ;;  %v147_v2 = vld [vmem:[%s200_s1 + $0x28] sm:$0xff] }
   0x2   :  { %83 = vmatpush.bf16.msra.mxu0 %v149_v0  ;;  %v146_v3 = vld [vmem:[%s200_s1 + $0x20] sm:$0xff]  ;;  %v145_v4 = vld [vmem:[%s200_s1 + $0x18] sm:$0xff]  ;;  %v144_v5 = vld [vmem:[%s200_s1 + $0x10] sm:$0xff] }
   0x3   :  { %v143_v6 = vld [vmem:[%s200_s1 + $0x8] sm:$0xff]  ;;  %v142_v7 = vld [vmem:[%s200_s1] sm:$0xff] }
   0x4   :  { %v141_v8 = vld [vmem:[%s201_s0] sm:$0xff] }
   0x6   :  { %84 = vmatpush.bf16.msra.mxu0 %v148_v1 }
   0xa   :  { %85 = vmatpush.bf16.msra.mxu0 %v147_v2 }
   0xe   :  { %86 = vmatpush.bf16.msra.mxu0 %v146_v3 }
  0x12   :  { %87 = vmatpush.bf16.msra.mxu0 %v145_v4 }
  0x16   :  { %88 = vmatpush.bf16.msra.mxu0 %v144_v5 }
  0x1a   :  { %89 = vmatpush.bf16.msra.mxu0 %v143_v6 }
  0x1e   :  { %90 = vmatpush.bf16.msra.mxu0 %v142_v7 }
  0x21   :  { %91 = vmatmul.bf16.vlgmr.msra.gmra.mxu0 %v141_v8 }
  0x9e   :  { %v92_v9 = vpop.f32.mrf.mxu0 }
  0xa6   :  { %v94_v10 = vpop.f32.mrf.mxu0 }
  0xa7   :  { %v153_v11 = vpack.c.bf16 %v94_v10, %v92_v9 }
  0xa9   :  { %154 = vst [vmem:[%s202_s2] sm:$0xff] %v153_v11  }

// kernel: gae_nn_forward.9
= control target key start
LH: loop header
LB: loop body
LE: loop exit
PB: predicated region body
PF: predicated region fallthrough
CT: control target
= control target key end

     0   :  { %vm35_vm0 = vcmask 130048   ;;  %s106_s1 = inlined_call_operand.vmem [shape: bf16[16,128], index: 1, kind: input, shape index: {}]   ;;  %s107_s0 = inlined_call_operand.vmem [shape: bf16[16,16], index: 0, kind: input, shape index: {}]   ;;  %s108_s2 = inlined_call_operand.vmem [shape: f32[16,128], index: 2, kind: output, shape index: {}]  }
   0x1   :  { %v78_v0 = vld [vmem:[%s106_s1] sm:$0xff] }
   0x2   :  { %v77_v1 = vld [vmem:[%s107_s0] sm:$0xff]  ;;  %46 = vmatpush.bf16.msra.mxu0 %v78_v0 }
   0x5   :  { %76 = vmatmul.msk.bf16.vlgmr.msra.gmra.mxu0 %vm35_vm0, %v77_v1 }
  0x82   :  { %v48_v2 = vpop.f32.mrf.mxu0 }
  0x83   :  { %62 = vst [vmem:[%s108_s2] sm:$0xff] %v48_v2 }
  0x8a   :  { %v50_v3 = vpop.f32.mrf.mxu0 }
  0x8b   :  { %63 = vst [vmem:[%s108_s2 + $0x8] sm:$0xff] %v50_v3 }

// kernel: gae_nn_forward.6
= control target key start
LH: loop header
LB: loop body
LE: loop exit
PB: predicated region body
PF: predicated region fallthrough
CT: control target
= control target key end

     0   :  { %s153_s1 = inlined_call_operand.vmem [shape: f32[128,128], index: 1, kind: input, shape index: {}]   ;;  %s154_s0 = inlined_call_operand.vmem [shape: f32[16,128], index: 0, kind: input, shape index: {}]   ;;  %s155_s2 = inlined_call_operand.vmem [shape: bf16[16,128], index: 2, kind: output, shape index: {}]  }
   0x1   :  { %v28_v0 = vld [vmem:[%s153_s1 + $0x78] sm:$0xff]  ;;  %v27_v1 = vld [vmem:[%s153_s1 + $0x70] sm:$0xff]  ;;  %v26_v2 = vld [vmem:[%s153_s1 + $0x68] sm:$0xff] }
   0x2   :  { %29 = vmatpush.msra.mxu0 %v28_v0  ;;  %65 = vmatpush.msra.mxu1 %v28_v0  ;;  %v25_v3 = vld [vmem:[%s153_s1 + $0x60] sm:$0xff]  ;;  %v24_v4 = vld [vmem:[%s153_s1 + $0x58] sm:$0xff]  ;;  %v23_v5 = vld [vmem:[%s153_s1 + $0x50] sm:$0xff] }
   0x3   :  { %v22_v6 = vld [vmem:[%s153_s1 + $0x48] sm:$0xff]  ;;  %v21_v7 = vld [vmem:[%s153_s1 + $0x40] sm:$0xff]  ;;  %v20_v8 = vld [vmem:[%s153_s1 + $0x38] sm:$0xff] }
   0x4   :  { %30 = vmatpush.msra.mxu0 %v27_v1  ;;  %66 = vmatpush.msra.mxu1 %v27_v1  ;;  %v19_v9 = vld [vmem:[%s153_s1 + $0x30] sm:$0xff]  ;;  %v18_v10 = vld [vmem:[%s153_s1 + $0x28] sm:$0xff]  ;;  %v17_v11 = vld [vmem:[%s153_s1 + $0x20] sm:$0xff] }
   0x5   :  { %v16_v12 = vld [vmem:[%s153_s1 + $0x18] sm:$0xff]  ;;  %v15_v13 = vld [vmem:[%s153_s1 + $0x10] sm:$0xff]  ;;  %v14_v14 = vld [vmem:[%s153_s1 + $0x8] sm:$0xff] }
   0x6   :  { %31 = vmatpush.msra.mxu0 %v26_v2  ;;  %67 = vmatpush.msra.mxu1 %v26_v2  ;;  %v13_v15 = vld [vmem:[%s153_s1] sm:$0xff]  ;;  %v12_v17 = vld [vmem:[%s154_s0 + $0x8] sm:$0xff] }
   0x7   :  { %v11_v16 = vld [vmem:[%s154_s0] sm:$0xff] }
   0x8   :  { %32 = vmatpush.msra.mxu0 %v25_v3  ;;  %68 = vmatpush.msra.mxu1 %v25_v3 }
   0xa   :  { %33 = vmatpush.msra.mxu0 %v24_v4  ;;  %69 = vmatpush.msra.mxu1 %v24_v4 }
   0xc   :  { %34 = vmatpush.msra.mxu0 %v23_v5  ;;  %70 = vmatpush.msra.mxu1 %v23_v5 }
   0xe   :  { %35 = vmatpush.msra.mxu0 %v22_v6  ;;  %71 = vmatpush.msra.mxu1 %v22_v6 }
  0x10   :  { %36 = vmatpush.msra.mxu0 %v21_v7  ;;  %72 = vmatpush.msra.mxu1 %v21_v7 }
  0x12   :  { %37 = vmatpush.msra.mxu0 %v20_v8  ;;  %73 = vmatpush.msra.mxu1 %v20_v8 }
  0x14   :  { %38 = vmatpush.msra.mxu0 %v19_v9  ;;  %74 = vmatpush.msra.mxu1 %v19_v9 }
  0x16   :  { %39 = vmatpush.msra.mxu0 %v18_v10  ;;  %75 = vmatpush.msra.mxu1 %v18_v10 }
  0x18   :  { %40 = vmatpush.msra.mxu0 %v17_v11  ;;  %76 = vmatpush.msra.mxu1 %v17_v11 }
  0x1a   :  { %41 = vmatpush.msra.mxu0 %v16_v12  ;;  %77 = vmatpush.msra.mxu1 %v16_v12 }
  0x1c   :  { %42 = vmatpush.msra.mxu0 %v15_v13  ;;  %78 = vmatpush.msra.mxu1 %v15_v13 }
  0x1e   :  { %43 = vmatpush.msra.mxu0 %v14_v14  ;;  %79 = vmatpush.msra.mxu1 %v14_v14 }
  0x20   :  { %44 = vmatpush.msra.mxu0 %v13_v15  ;;  %80 = vmatpush.msra.mxu1 %v13_v15 }
  0x21   :  { %45 = vmatmul.f32.vlgmr.msra.gmra.mxu0 %v11_v16  ;;  %48 = vmatmul.f32.vlgmr.msra.gmra.mxu1 %v12_v17 }
  0x9e   :  { %v46_v18 = vpop.f32.mrf.mxu0  ;;  %v49_v19 = vpop.f32.mrf.mxu1 }
  0x9f   :  { %v63_v20 = vpack.c.bf16 %v49_v19, %v46_v18 }
  0xa1   :  { %64 = vst [vmem:[%s155_s2] sm:$0xff] %v63_v20  }

// kernel: gae_nn_forward.11
= control target key start
LH: loop header
LB: loop body
LE: loop exit
PB: predicated region body
PF: predicated region fallthrough
CT: control target
= control target key end

     0   :  { %v94_v1 = vmov 0   ;;  %s125_s0 = inlined_call_operand.vmem [shape: bf16[16,16], index: 0, kind: input, shape index: {}]   ;;  %s126_s1 = inlined_call_operand.vmem [shape: f32[16,1], index: 1, kind: input, shape index: {}]   ;;  %s127_s2 = inlined_call_operand.hbm [shape: f32[16,16], index: 2, kind: output, shape index: {}]  }
   0x1   :  { %v12_v0 = vld [vmem:[%s126_s1] sm:$0xff]  ;;  %63 = vset.pattern.permute.xlu0 %v94_v1 }
   0x2   :  { %64 = vrcp.f32 %v12_v0 }
   0x3   :  { %7 = vsyncpa [#allocation3], 0  ;;  %v13_v2 = vld [vmem:[%s126_s1 + $0x8] sm:$0xff]  ;;  %v56_v5 = vld [vmem:[%s125_s0] sm:$0xff]   ;;  %vm34_vm0 = vcmask 130048   ;;  %s95_s15 = smov [#allocation2]  }
   0x4   :  { %66 = vrcp.f32 %v13_v2  ;;  %v57_v6 = vunpack.c.l.bf16 %v56_v5  ;;  %v58_v10 = vunpack.c.h.bf16 %v56_v5  ;;  %s41_s16 = sshll.u32 %s95_s15, 4  ;;  %s43_s18 = sshll.u32 %s127_s2, 4  ;;  %s42_s16 = int_to_ptr.vmem [resolvable:$true] %s41_s16  ;;  %s44_s18 = int_to_ptr.hbm [resolvable:$true] %s43_s18 }
   0x5   :  { %s96_s0 = smov 128   ;;  %s97_s19 = smov 8  }
   0x8   :  { %v65_v3 = vpop.eup %64 }
   0x9   :  { %22 = vperm.xlu0 %63, %v65_v3  }
   0xa   :  { %v67_v4 = vpop.eup %66 }
  0x11   :  { %27 = vperm.xlu0 %63, %v67_v4  }
  0x7b   :  { %v23_v7 = vpop.permute.xlu0 %22 }
  0x7c   :  { %v30_v8 = vmul.f32 %v57_v6, %v23_v7 }
  0x7e   :  { %v32_v9 = vadd.f32 1e-10, %v30_v8 }
  0x80   :  { %35 = vst.msk [vmem:[#allocation2] sm:$0xff] %vm34_vm0, %v32_v9 }
  0x83   :  { %v28_v11 = vpop.permute.xlu0 %27 }
  0x84   :  { %v31_v12 = vmul.f32 %v58_v10, %v28_v11 }
  0x86   :  { %v33_v13 = vadd.f32 1e-10, %v31_v12 }
  0x88   :  { %36 = vst.msk [vmem:[#allocation2 + $0x8] sm:$0xff] %vm34_vm0, %v33_v13 }
  0x89   :  { %49 = dma.vmem_to_hbm [thread:$0]  %s42_s16, 256, %s44_s18, [#allocation3], %s96_s0, %s96_s0, %s97_s19  }
  0x8a   :  { %92 = dma.done.wait [#allocation3], 256  }
  0x8b   :  { %93 = vsyncadd [#allocation3], 4294967040 }
  0x8c   :  { %54 = vsyncpa [#allocation3], 1 }

// kernel: gae_nn_forward.10
= control target key start
LH: loop header
LB: loop body
LE: loop exit
PB: predicated region body
PF: predicated region fallthrough
CT: control target
= control target key end

     0   :  { %v232_v2 = vmov 0   ;;  %vm152_vm0 = vcmask 7168   ;;  %v233_v17 = vmov 0.0   ;;  %v136_v22 = vlaneseq  ;;  %s328_s1 = inlined_call_operand.vmem [shape: bf16[128,16], index: 1, kind: input, shape index: {}]   ;;  %s329_s2 = inlined_call_operand.vmem [shape: f32[16,1], index: 2, kind: input, shape index: {}]   ;;  %s330_s3 = inlined_call_operand.vmem [shape: f32[1,16], index: 3, kind: input, shape index: {}]   ;;  %s331_s0 = inlined_call_operand.vmem [shape: bf16[16,128], index: 0, kind: input, shape index: {}]   ;;  %s332_s5 = inlined_call_operand.vmem [shape: f32[16,1], index: 5, kind: output, shape index: {1}]   ;;  %s333_s4 = inlined_call_operand.vmem [shape: bf16[16,16], index: 4, kind: output, shape index: {0}]  }
   0x1   :  { %v223_v0 = vld [vmem:[%s328_s1 + $0x38] sm:$0xff]  ;;  %v222_v1 = vld [vmem:[%s328_s1 + $0x30] sm:$0xff]  ;;  %226 = vset.pattern.permute.xlu0 %v232_v2  ;;  %v105_v3 = vld [vmem:[%s329_s2] sm:$0xff]  ;;  %153 = vst.msk [vmem:[%s332_s5] sm:$0xff] %vm152_vm0, %v233_v17  ;;  %vm145_vm2 = vcmask 125952   ;;  %vm159_vm3 = vcmask 130048  }
   0x2   :  { %91 = vmatpush.bf16.msra.mxu0 %v223_v0  ;;  %110 = vperm.xlu0 %226, %v105_v3   ;;  %v221_v4 = vld [vmem:[%s328_s1 + $0x28] sm:$0xff]  ;;  %v220_v6 = vld [vmem:[%s328_s1 + $0x20] sm:$0xff]  ;;  %v219_v7 = vld [vmem:[%s328_s1 + $0x18] sm:$0xff]  ;;  %154 = vst.msk [vmem:[%s332_s5 + $0x8] sm:$0xff] %vm152_vm0, %v233_v17  ;;  %v137_v28 = vand.u32 127, %v136_v22 }
   0x3   :  { %v106_v5 = vld [vmem:[%s329_s2 + $0x8] sm:$0xff]  ;;  %v218_v8 = vld [vmem:[%s328_s1 + $0x10] sm:$0xff]  ;;  %v216_v10 = vld [vmem:[%s328_s1] sm:$0xff] }
   0x4   :  { %v217_v9 = vld [vmem:[%s328_s1 + $0x8] sm:$0xff]  ;;  %v215_v11 = vld [vmem:[%s331_s0] sm:$0xff]  ;;  %vm140_vm1 = vcmp.lt.s32.totalorder %v137_v28, 16 }
   0x5   :  { %v227_v12 = vld [vmem:[%s330_s3] ss:$0 sm:$0xff] }
   0x6   :  { %92 = vmatpush.bf16.msra.mxu0 %v222_v1 }
   0x8   :  { %v155_v42 = vld [vmem:[%s332_s5] sm:$0xff] }
   0x9   :  { %v156_v45 = vld [vmem:[%s332_s5 + $0x8] sm:$0xff] }
   0xa   :  { %93 = vmatpush.bf16.msra.mxu0 %v221_v4  ;;  %115 = vperm.xlu0 %226, %v106_v5  }
   0xe   :  { %94 = vmatpush.bf16.msra.mxu0 %v220_v6 }
  0x12   :  { %95 = vmatpush.bf16.msra.mxu0 %v219_v7 }
  0x16   :  { %96 = vmatpush.bf16.msra.mxu0 %v218_v8 }
  0x1a   :  { %97 = vmatpush.bf16.msra.mxu0 %v217_v9 }
  0x1e   :  { %98 = vmatpush.bf16.msra.mxu0 %v216_v10 }
  0x21   :  { %99 = vmatmul.bf16.vlgmr.msra.gmra.mxu0 %v215_v11 }
  0x74   :  { %v111_v13 = vpop.permute.xlu0 %110 }
  0x75   :  { %v121_v14 = vadd.f32 %v227_v12, %v111_v13 }
  0x7c   :  { %v116_v20 = vpop.permute.xlu0 %115 }
  0x7d   :  { %v122_v24 = vadd.f32 %v227_v12, %v116_v20 }
  0x9e   :  { %v100_v15 = vpop.f32.mrf.mxu0 }
  0x9f   :  { %v123_v16 = vmul.f32 2.0, %v100_v15 }
  0xa1   :  { %v125_v18 = vsub.f32 %v121_v14, %v123_v16 }
  0xa3   :  { %v127_v19 = vmax.f32 %v125_v18, 0.0 }
  0xa5   :  { %v129_v21 = vsub.f32 0.0, %v127_v19 }
  0xa6   :  { %v102_v23 = vpop.f32.mrf.mxu0 }
  0xa7   :  { %v131_v25 = vmul.f32 1.442695, %v129_v21  ;;  %v124_v26 = vmul.f32 2.0, %v102_v23 }
  0xa9   :  { %228 = vpow2.f32 %v131_v25  ;;  %v126_v27 = vsub.f32 %v122_v24, %v124_v26 }
  0xab   :  { %v128_v29 = vmax.f32 %v126_v27, 0.0 }
  0xad   :  { %v130_v30 = vsub.f32 0.0, %v128_v29 }
  0xaf   :  { %v229_v31 = vpop.eup %228  ;;  %v133_v32 = vmul.f32 1.442695, %v130_v30 }
  0xb0   :  { %v141_v33 = vsel %vm140_vm1, %v229_v31, 0.0 }
  0xb1   :  { %230 = vpow2.f32 %v133_v32  ;;  %v143_v34 = vpack.c.bf16 %v141_v33, %v141_v33 }
  0xb3   :  { %v157_v35 = vunpack.c.l.bf16 %v143_v34  ;;  %146 = vst.msk [vmem:[%s333_s4] sm:$0xf] %vm145_vm2, %v143_v34 }
  0xb5   :  { %v160_v36 = vsel %vm159_vm3, %v157_v35, 0.0 }
  0xb6   :  { %161 = vadd.xlane.f32.xlu1 %v160_v36 }
  0xb7   :  { %v231_v37 = vpop.eup %230 }
  0xb8   :  { %v142_v38 = vsel %vm140_vm1, %v231_v37, 0.0 }
  0xb9   :  { %v144_v39 = vpack.c.bf16 %v142_v38, %v142_v38 }
  0xbb   :  { %v158_v40 = vunpack.c.l.bf16 %v144_v39  ;;  %147 = vst.msk [vmem:[%s333_s4 + $0x4] sm:$0xf] %vm145_vm2, %v144_v39 }
  0xbd   :  { %v163_v41 = vsel %vm159_vm3, %v158_v40, 0.0 }
  0xbe   :  { %164 = vadd.xlane.f32.xlu1 %v163_v41 }
 0x129   :  { %v162_v43 = vpop.xlane.xlu1 %161 }
 0x12a   :  { %v166_v44 = vadd.f32 %v162_v43, %v155_v42 }
 0x12c   :  { %169 = vst.msk [vmem:[%s332_s5] sm:$0xff] %vm152_vm0, %v166_v44 }
 0x131   :  { %v165_v46 = vpop.xlane.xlu1 %164 }
 0x132   :  { %v167_v47 = vadd.f32 %v165_v46, %v156_v45 }
 0x134   :  { %170 = vst.msk [vmem:[%s332_s5 + $0x8] sm:$0xff] %vm152_vm0, %v167_v47 }

</bundles_post_ra>
